<compile_context>
chip_gen: v7x
topology: tpu7x:2x2x1
jax: 0.10.0
libtpu: 0.0.40
codegen_flags: <defaults>
</compile_context>

<pallas_src>
import functools

import jax
import jax.numpy as jnp
from jax.experimental import pallas as pl
from jax.experimental.pallas import tpu as pltpu

HIDDEN1 = 32
HIDDEN2 = 16


def _policy_kernel(x_ref, w1_ref, b1_ref, w2_ref, b2_ref, wh_ref, bh_ref,
                   mean_ref, std_ref, *, action_dims):
    # x tile: [TB, obs_dims]. No explicit upcast — the dot accumulates in f32
    # (preferred_element_type); a bf16 x therefore feeds the MXU directly.
    x = x_ref[...]

    h1 = jnp.tanh(
        jnp.dot(x, w1_ref[...], preferred_element_type=jnp.float32)
        + b1_ref[...])                                              # [TB, 32]
    h2 = jnp.tanh(
        jnp.dot(h1, w2_ref[...], preferred_element_type=jnp.float32)
        + b2_ref[...])                                              # [TB, 16]

    # Fused heads: one matmul producing [TB, 2A] = [means | stddev-logits].
    z = (jnp.dot(h2, wh_ref[...], preferred_element_type=jnp.float32)
         + bh_ref[...])                                             # [TB, 2A]

    zm = z[:, :action_dims]
    zs = z[:, action_dims:]

    mean_ref[...] = zm
    # Stable softplus: log(1 + exp(zs)) without overflow for large zs.
    std_ref[...] = jnp.maximum(zs, 0.0) + jnp.log1p(jnp.exp(-jnp.abs(zs)))


def policy_network_forward(x, params, *, tb=512):
    """x: [B, obs_dims] (f32 or bf16). Returns (action_means, action_stddevs), f32."""
    w1, b1, w2, b2, wm, bm, ws, bs = params
    B, obs_dims = x.shape
    A = wm.shape[1]

    # Fuse the two output heads into a single matmul weight / bias.
    w_heads = jnp.concatenate([wm, ws], axis=1)        # [16, 2A]
    b_heads = jnp.concatenate([bm, bs], axis=1)        # [1, 2A]

    # Batch tile: large multiple of 8 when B is big (pipelining + megacore),
    # otherwise the full batch (block equal to the array dim is always legal).
    TB = tb if B >= tb else B
    grid = (pl.cdiv(B, TB),)

    kernel = functools.partial(_policy_kernel, action_dims=A)

    out_shapes = (
        jax.ShapeDtypeStruct((B, A), jnp.float32),
        jax.ShapeDtypeStruct((B, A), jnp.float32),
    )

    cost = pl.CostEstimate(
        flops=2 * B * (obs_dims * HIDDEN1 + HIDDEN1 * HIDDEN2 + HIDDEN2 * 2 * A),
        transcendentals=B * (HIDDEN1 + HIDDEN2 + 2 * A),
        bytes_accessed=(x.size * x.dtype.itemsize
                        + sum(p.size * p.dtype.itemsize for p in params)
                        + 2 * B * A * 4),
    )

    return pl.pallas_call(
        kernel,
        out_shape=out_shapes,
        grid=grid,
        in_specs=[
            pl.BlockSpec((TB, obs_dims), lambda i: (i, 0)),        # x tile
            pl.BlockSpec((obs_dims, HIDDEN1), lambda i: (0, 0)),   # W1
            pl.BlockSpec((1, HIDDEN1), lambda i: (0, 0)),          # b1
            pl.BlockSpec((HIDDEN1, HIDDEN2), lambda i: (0, 0)),    # W2
            pl.BlockSpec((1, HIDDEN2), lambda i: (0, 0)),          # b2
            pl.BlockSpec((HIDDEN2, 2 * A), lambda i: (0, 0)),      # W_heads
            pl.BlockSpec((1, 2 * A), lambda i: (0, 0)),            # b_heads
        ],
        out_specs=(
            pl.BlockSpec((TB, A), lambda i: (i, 0)),               # means
            pl.BlockSpec((TB, A), lambda i: (i, 0)),               # stddevs
        ),
        compiler_params=pltpu.CompilerParams(
            dimension_semantics=("parallel",)),
        cost_estimate=cost,
    )(x, w1, b1, w2, b2, w_heads, b_heads)


def init_params(obs_dims, action_dims, key):
    """Weights = ones (torch.nn.init.ones_); biases = deterministic stand-ins."""
    kb1, kb2, kbm, kbs = jax.random.split(key, 4)
    w1 = jnp.ones((obs_dims, HIDDEN1), jnp.float32)
    b1 = jax.random.uniform(kb1, (1, HIDDEN1), jnp.float32, -0.1, 0.1)
    w2 = jnp.ones((HIDDEN1, HIDDEN2), jnp.float32)
    b2 = jax.random.uniform(kb2, (1, HIDDEN2), jnp.float32, -0.1, 0.1)
    wm = jnp.ones((HIDDEN2, action_dims), jnp.float32)
    bm = jax.random.uniform(kbm, (1, action_dims), jnp.float32, -0.1, 0.1)
    ws = jnp.ones((HIDDEN2, action_dims), jnp.float32)
    bs = jax.random.uniform(kbs, (1, action_dims), jnp.float32, -0.1, 0.1)
    return (w1, b1, w2, b2, wm, bm, ws, bs)


def _reference(x, params):
    """Pure-JAX reference."""
    w1, b1, w2, b2, wm, bm, ws, bs = params
    xf = x.astype(jnp.float32)
    h1 = jnp.tanh(xf @ w1 + b1)
    h2 = jnp.tanh(h1 @ w2 + b2)
    means = h2 @ wm + bm
    stds = jax.nn.softplus(h2 @ ws + bs)
    return means, stds


if __name__ == "__main__":
    key = jax.random.PRNGKey(0)
    k_x, k_x2, k_p = jax.random.split(key, 3)

    obs_dims = 4      # obs_space_dims
    action_dims = 2   # action_space_dims
    params = init_params(obs_dims, action_dims, k_p)

    # Small case (matches the module's toy usage): batch = 2.
    x_small = jax.random.normal(k_x, (2, obs_dims), jnp.float32)
    means, stds = policy_network_forward(x_small, params)
    jax.block_until_ready((means, stds))
    ref_means, ref_stds = _reference(x_small, params)
    assert means.shape == (2, action_dims) and stds.shape == (2, action_dims)
    assert jnp.allclose(means, ref_means, atol=1e-5, rtol=1e-5)
    assert jnp.allclose(stds, ref_stds, atol=1e-5, rtol=1e-5)

    # Multi-tile case: exercises the batch grid with a partial last block.
    x_big = jax.random.normal(k_x2, (640, obs_dims), jnp.float32)
    means_b, stds_b = policy_network_forward(x_big, params)
    jax.block_until_ready((means_b, stds_b))
    ref_means_b, ref_stds_b = _reference(x_big, params)
    assert jnp.allclose(means_b, ref_means_b, atol=1e-5, rtol=1e-5)
    assert jnp.allclose(stds_b, ref_stds_b, atol=1e-5, rtol=1e-5)

    print("KERNEL_OK")
</pallas_src>

<mosaic_0001>
module attributes {stable_mosaic.version = 11 : i64} {
  func.func @_policy_kernel(%arg0: i32, %arg1: memref<2x4xf32, #tpu.memory_space<vmem>>, %arg2: memref<4x32xf32, #tpu.memory_space<vmem>>, %arg3: memref<1x32xf32, #tpu.memory_space<vmem>>, %arg4: memref<32x16xf32, #tpu.memory_space<vmem>>, %arg5: memref<1x16xf32, #tpu.memory_space<vmem>>, %arg6: memref<16x4xf32, #tpu.memory_space<vmem>>, %arg7: memref<1x4xf32, #tpu.memory_space<vmem>>, %arg8: memref<2x2xf32, #tpu.memory_space<vmem>>, %arg9: memref<2x2xf32, #tpu.memory_space<vmem>>) attributes {dimension_semantics = [#tpu.dimension_semantics<parallel>], iteration_bounds = array<i64: 1>, scalar_prefetch = 0 : i64, scratch_operands = 0 : i64, tpu.core_type = #tpu.core_type<tc>, window_params = [{transform_indices = @transform_0, window_bounds = array<i64: 2, 4>}, {pipeline_mode = #tpu.pipeline_mode<synchronous>, transform_indices = @transform_1, window_bounds = array<i64: 4, 32>}, {pipeline_mode = #tpu.pipeline_mode<synchronous>, transform_indices = @transform_2, window_bounds = array<i64: 1, 32>}, {pipeline_mode = #tpu.pipeline_mode<synchronous>, transform_indices = @transform_3, window_bounds = array<i64: 32, 16>}, {pipeline_mode = #tpu.pipeline_mode<synchronous>, transform_indices = @transform_4, window_bounds = array<i64: 1, 16>}, {pipeline_mode = #tpu.pipeline_mode<synchronous>, transform_indices = @transform_5, window_bounds = array<i64: 16, 4>}, {pipeline_mode = #tpu.pipeline_mode<synchronous>, transform_indices = @transform_6, window_bounds = array<i64: 1, 4>}, {transform_indices = @transform_7, window_bounds = array<i64: 2, 2>}, {transform_indices = @transform_8, window_bounds = array<i64: 2, 2>}]} {
    %c0 = arith.constant 0 : index
    %c0_0 = arith.constant 0 : index
    %0 = vector.load %arg1[%c0, %c0_0] : memref<2x4xf32, #tpu.memory_space<vmem>>, vector<2x4xf32>
    %c0_1 = arith.constant 0 : index
    %c0_2 = arith.constant 0 : index
    %1 = vector.load %arg2[%c0_1, %c0_2] : memref<4x32xf32, #tpu.memory_space<vmem>>, vector<4x32xf32>
    %cst = arith.constant dense<0.000000e+00> : vector<2x32xf32>
    %2 = tpu.matmul %0, %1, %cst {dimension_numbers = #tpu.dot_dimension_numbers<[1], [0], [0], [1], [0, 0, 1, 1], [], []>} : vector<2x4xf32>, vector<4x32xf32>, vector<2x32xf32> -> vector<2x32xf32>
    %c0_3 = arith.constant 0 : index
    %c0_4 = arith.constant 0 : index
    %3 = vector.load %arg3[%c0_3, %c0_4] : memref<1x32xf32, #tpu.memory_space<vmem>>, vector<1x32xf32>
    %4 = vector.broadcast %3 : vector<1x32xf32> to vector<2x32xf32>
    %5 = arith.addf %2, %4 : vector<2x32xf32>
    %6 = math.tanh %5 : vector<2x32xf32>
    %c0_5 = arith.constant 0 : index
    %c0_6 = arith.constant 0 : index
    %7 = vector.load %arg4[%c0_5, %c0_6] : memref<32x16xf32, #tpu.memory_space<vmem>>, vector<32x16xf32>
    %cst_7 = arith.constant dense<0.000000e+00> : vector<2x16xf32>
    %8 = tpu.matmul %6, %7, %cst_7 {dimension_numbers = #tpu.dot_dimension_numbers<[1], [0], [0], [1], [0, 0, 1, 1], [], []>} : vector<2x32xf32>, vector<32x16xf32>, vector<2x16xf32> -> vector<2x16xf32>
    %c0_8 = arith.constant 0 : index
    %c0_9 = arith.constant 0 : index
    %9 = vector.load %arg5[%c0_8, %c0_9] : memref<1x16xf32, #tpu.memory_space<vmem>>, vector<1x16xf32>
    %10 = vector.broadcast %9 : vector<1x16xf32> to vector<2x16xf32>
    %11 = arith.addf %8, %10 : vector<2x16xf32>
    %12 = math.tanh %11 : vector<2x16xf32>
    %c0_10 = arith.constant 0 : index
    %c0_11 = arith.constant 0 : index
    %13 = vector.load %arg6[%c0_10, %c0_11] : memref<16x4xf32, #tpu.memory_space<vmem>>, vector<16x4xf32>
    %cst_12 = arith.constant dense<0.000000e+00> : vector<2x4xf32>
    %14 = tpu.matmul %12, %13, %cst_12 {dimension_numbers = #tpu.dot_dimension_numbers<[1], [0], [0], [1], [0, 0, 1, 1], [], []>} : vector<2x16xf32>, vector<16x4xf32>, vector<2x4xf32> -> vector<2x4xf32>
    %c0_13 = arith.constant 0 : index
    %c0_14 = arith.constant 0 : index
    %15 = vector.load %arg7[%c0_13, %c0_14] : memref<1x4xf32, #tpu.memory_space<vmem>>, vector<1x4xf32>
    %16 = vector.broadcast %15 : vector<1x4xf32> to vector<2x4xf32>
    %17 = arith.addf %14, %16 : vector<2x4xf32>
    %18 = vector.extract_strided_slice %17 {offsets = [0, 0], sizes = [2, 2], strides = [1, 1]} : vector<2x4xf32> to vector<2x2xf32>
    %19 = vector.extract_strided_slice %17 {offsets = [0, 2], sizes = [2, 2], strides = [1, 1]} : vector<2x4xf32> to vector<2x2xf32>
    %c0_15 = arith.constant 0 : index
    %c0_16 = arith.constant 0 : index
    %20 = vector.load %arg8[%c0_15, %c0_16] : memref<2x2xf32, #tpu.memory_space<vmem>>, vector<2x2xf32>
    tpu.vector_store %arg8[%c0_15, %c0_16], %18 {strides = array<i32>} : memref<2x2xf32, #tpu.memory_space<vmem>>, vector<2x2xf32>,
    %cst_17 = arith.constant 0.000000e+00 : f32
    %21 = vector.broadcast %cst_17 : f32 to vector<2x2xf32>
    %22 = arith.maximumf %19, %21 : vector<2x2xf32>
    %23 = math.absf %19 : vector<2x2xf32>
    %cst_18 = arith.constant 0.000000e+00 : f32
    %24 = vector.broadcast %cst_18 : f32 to vector<2x2xf32>
    %25 = arith.subf %24, %23 : vector<2x2xf32>
    %26 = math.exp %25 : vector<2x2xf32>
    %27 = math.log1p %26 : vector<2x2xf32>
    %28 = arith.addf %22, %27 : vector<2x2xf32>
    %c0_19 = arith.constant 0 : index
    %c0_20 = arith.constant 0 : index
    %29 = vector.load %arg9[%c0_19, %c0_20] : memref<2x2xf32, #tpu.memory_space<vmem>>, vector<2x2xf32>
    tpu.vector_store %arg9[%c0_19, %c0_20], %28 {strides = array<i32>} : memref<2x2xf32, #tpu.memory_space<vmem>>, vector<2x2xf32>,
    return
  }
  func.func @transform_0(%arg0: i32) -> (i32, i32) {
    %c0_i32 = arith.constant 0 : i32
    %c0_i32_0 = arith.constant 0 : i32
    return %arg0, %c0_i32 : i32, i32
  }
  func.func @transform_1(%arg0: i32) -> (i32, i32) {
    %c0_i32 = arith.constant 0 : i32
    %c0_i32_0 = arith.constant 0 : i32
    %c0_i32_1 = arith.constant 0 : i32
    return %c0_i32, %c0_i32_0 : i32, i32
  }
  func.func @transform_2(%arg0: i32) -> (i32, i32) {
    %c0_i32 = arith.constant 0 : i32
    %c0_i32_0 = arith.constant 0 : i32
    %c0_i32_1 = arith.constant 0 : i32
    return %c0_i32, %c0_i32_0 : i32, i32
  }
  func.func @transform_3(%arg0: i32) -> (i32, i32) {
    %c0_i32 = arith.constant 0 : i32
    %c0_i32_0 = arith.constant 0 : i32
    %c0_i32_1 = arith.constant 0 : i32
    return %c0_i32, %c0_i32_0 : i32, i32
  }
  func.func @transform_4(%arg0: i32) -> (i32, i32) {
    %c0_i32 = arith.constant 0 : i32
    %c0_i32_0 = arith.constant 0 : i32
    %c0_i32_1 = arith.constant 0 : i32
    return %c0_i32, %c0_i32_0 : i32, i32
  }
  func.func @transform_5(%arg0: i32) -> (i32, i32) {
    %c0_i32 = arith.constant 0 : i32
    %c0_i32_0 = arith.constant 0 : i32
    %c0_i32_1 = arith.constant 0 : i32
    return %c0_i32, %c0_i32_0 : i32, i32
  }
  func.func @transform_6(%arg0: i32) -> (i32, i32) {
    %c0_i32 = arith.constant 0 : i32
    %c0_i32_0 = arith.constant 0 : i32
    %c0_i32_1 = arith.constant 0 : i32
    return %c0_i32, %c0_i32_0 : i32, i32
  }
  func.func @transform_7(%arg0: i32) -> (i32, i32) {
    %c0_i32 = arith.constant 0 : i32
    %c0_i32_0 = arith.constant 0 : i32
    return %arg0, %c0_i32 : i32, i32
  }
  func.func @transform_8(%arg0: i32) -> (i32, i32) {
    %c0_i32 = arith.constant 0 : i32
    %c0_i32_0 = arith.constant 0 : i32
    return %arg0, %c0_i32 : i32, i32
  }
}

</mosaic_0001>

<bundles_post_ra>
// kernel: tpu_custom_call.1
= control target key start
LH: loop header
LB: loop body
LE: loop exit
PB: predicated region body
PF: predicated region fallthrough
CT: control target
= control target key end

     0   :  { %14 = vsyncpa [#allocation3], 0  ;;  %vm43_vm0 = vcmask 1043456   ;;  %vm39_vm1 = vcmask 31744   ;;  %v448_v1 = vmov 0.0   ;;  %vm449_vm2 = vmmov 0   ;;  %s558_s0 = inlined_call_operand.vmem [shape: f32[2,4], index: 0, kind: input, shape index: {}]   ;;  %s559_s1 = inlined_call_operand.vmem [shape: f32[4,32], index: 1, kind: input, shape index: {}]   ;;  %s560_s2 = inlined_call_operand.vmem [shape: f32[1,32], index: 2, kind: input, shape index: {}]   ;;  %s561_s3 = inlined_call_operand.vmem [shape: f32[32,16], index: 3, kind: input, shape index: {}]   ;;  %s562_s4 = inlined_call_operand.vmem [shape: f32[1,16], index: 4, kind: input, shape index: {}]   ;;  %s563_s5 = inlined_call_operand.vmem [shape: f32[16,4], index: 5, kind: input, shape index: {}]   ;;  %s564_s6 = inlined_call_operand.vmem [shape: f32[1,4], index: 6, kind: input, shape index: {}]   ;;  %s565_s7 = inlined_call_operand.hbm [shape: f32[2,2], index: 7, kind: output, shape index: {0}]   ;;  %s566_s8 = inlined_call_operand.hbm [shape: f32[2,2], index: 8, kind: output, shape index: {1}]  }
   0x1   :  { %v31_v0 = vld [vmem:[%s559_s1] sm:$0xf]  ;;  %354 = vmatprep.subr.mxu0 %v448_v1  ;;  %356 = vmatprep.mubr.msk.f32.mxu0 %vm449_vm2, %v448_v1 }
   0x2   :  { %v30_v2 = vld [vmem:[%s558_s0] sm:$0x3] }
   0x3   :  { %15 = vsyncpa [#allocation5], 0  ;;  %355 = vmatpush3.msk.msra.mxu0 %vm43_vm0, %v31_v0  ;;  %367 = vmatprep.mubr.msk.f32.mxu1 %vm449_vm2, %v448_v1  ;;  %v118_v3 = vld [vmem:[%s561_s3] sm:$0xff]  ;;  %v119_v4 = vld [vmem:[%s561_s3 + $0x8] sm:$0xff]  ;;  %v450_v6 = vmov 0.0|0.0   ;;  %vm129_vm3 = vcmask 261120  }
   0x4   :  { %357 = vmatmul.mubr.msk.f32.vlgmr.msra.gmra.mrb[0].mxu0 %vm39_vm1, %v30_v2  ;;  %v120_v5 = vld [vmem:[%s561_s3 + $0x10] sm:$0xff]  ;;  %377 = vmatprep.subr.bf16.mxu1 %v450_v6  ;;  %v378_v7 = vpack.c.bf16 %v119_v4, %v118_v3  ;;  %v121_v8 = vld [vmem:[%s561_s3 + $0x18] sm:$0xff]  ;;  %v337_v10 = vld [vmem:[%s560_s2] ss:$0 sm:$0xff]  ;;  %vm213_vm4 = vcmask 130048   ;;  %vm287_vm5 = vcmask 9216  }
   0x5   :  { %374 = vmatprep.mubr.msk.f32.mxu0 %vm449_vm2, %v448_v1  ;;  %383 = vmatprep.subr.bf16.mxu0 %v450_v6  ;;  %v381_v9 = vpack.c.bf16 %v121_v8, %v120_v5  ;;  %v204_v15 = vld [vmem:[%s563_s5] sm:$0xff]  ;;  %v205_v16 = vld [vmem:[%s563_s5 + $0x8] sm:$0xff] }
   0x6   :  { %379 = vmatpush3.bf16.msra.mxu1 %v378_v7  ;;  %v384_v17 = vpack.c.bf16 %v205_v16, %v204_v15  ;;  %v340_v18 = vld [vmem:[%s562_s4] ss:$0 sm:$0xff]  ;;  %s451_s4 = smov [#allocation2]  }
   0x7   :  { %380 = vmatprep.subr.bf16.mxu1 %v450_v6  ;;  %v342_v23 = vld [vmem:[%s564_s6] ss:$0 sm:$0xff]  ;;  %s315_s5 = sshll.u32 %s451_s4, 4  ;;  %s316_s5 = int_to_ptr.vmem [resolvable:$true] %s315_s5 }
   0x8   :  { %385 = vmatpush3.bf16.msra.mxu0 %v384_v17  ;;  %s400_s23 = scalar_lea.vmem %s316_s5, 32  ;;  %p405_p1 = scmp.lt.s32.totalorder %s316_s5, %s316_s5 }
   0x9   :  { %p401_p0 = scmp.ne.s32.totalorder %s316_s5, %s400_s23  ;;  %p406_p2 = scmp.lt.s32.totalorder %s400_s23, %s400_s23 }
   0xa   :  { %382 = vmatpush3.bf16.msra.mxu1 %v381_v9 }
   0xb   :  { %p407_p3 = por %p406_p2, %p405_p1 }
   0xd   :  { %p408_p4 = pnand %p407_p3, %p401_p0 }
  0xd7   :  { %v113_v11 = vpop.f32.mrb[0].mxu0 }
  0xd8   :  { %v114_v12 = vadd.f32 %v337_v10, %v113_v11  ;;  %v358_v13 = vpop.f32.mrb[1].mxu0 }
  0xda   :  { %392 = vtanh.f32 %v114_v12 }
  0xe4   :  { %v393_v14 = vpop.eup %392 }
  0xe5   :  { %368 = vmatmul.mubr.msk.f32.vlgmr.msra.gmra.mrb[0].mxu1 %vm129_vm3, %v393_v14 }
 0x1b8   :  { %v199_v19 = vpop.f32.mrb[0].mxu1 }
 0x1b9   :  { %v200_v20 = vadd.f32 %v340_v18, %v199_v19  ;;  %v369_v21 = vpop.f32.mrb[1].mxu1 }
 0x1bb   :  { %394 = vtanh.f32 %v200_v20 }
 0x1c5   :  { %v395_v22 = vpop.eup %394 }
 0x1c6   :  { %375 = vmatmul.mubr.msk.f32.vlgmr.msra.gmra.mrb[2].mxu0 %vm213_vm4, %v395_v22 }
 0x299   :  { %v283_v24 = vpop.f32.mrb[2].mxu0 }
 0x29a   :  { %v284_v25 = vadd.f32 %v342_v23, %v283_v24  ;;  %v376_v26 = vpop.f32.mrb[3].mxu0 }
 0x29c   :  { %v290_v27 = vand.u32 2147483647, %v284_v25  ;;  %288 = vst.msk [vmem:[#allocation2] sm:$0x3] %vm287_vm5, %v284_v25 }
 0x29e   :  { %v291_v28 = vsub.f32 0.0, %v290_v27 }
 0x2a0   :  { %v292_v29 = vmul.f32 1.442695, %v291_v28 }
 0x2a2   :  { %396 = vpow2.f32 %v292_v29 }
 0x2ac   :  { %v397_v30 = vpop.eup %396 }
 0x2ad   :  { %v294_v31 = vadd.f32 1.0, %v397_v30  ;;  %v297_v32 = vmul.f32 -0.5, %v397_v30 }
 0x2af   :  { %398 = vlog2.f32 %v294_v31 }
 0x2b0   :  { %411 = shalt.err (!%p408_p4)
}
 0x2b1   :  { %s412_s25 = scalar_lea.hbm %s565_s7, 32 }
 0x2b2   :  { %p413_p5 = scmp.ne.s32.totalorder %s565_s7, %s412_s25  ;;  %p416_p6 = scmp.lt.u32.totalorder %s412_s25, %s565_s7 }
 0x2b4   :  { %p418_p7 = pnand %p416_p6, %p413_p5 }
 0x2b6   :  { %421 = shalt.err (!%p418_p7)
}
 0x2b7   :  { %318 = dma.vmem_to_hbm [thread:$0]  %s316_s5, 32, %s565_s7, [#allocation3]   ;;  %v298_v33 = vadd.f32 1.0, %v297_v32  ;;  %v300_v34 = vand.u32 2147483647, %v397_v30  ;;  %v289_v38 = vmax.f32 %v284_v25, 0.0 }
 0x2b8   :  { %s452_s10 = smov 126   ;;  %s453_s1 = smov [#allocation4]  }
 0x2b9   :  { %v399_v35 = vpop.eup %398  ;;  %v299_v37 = vmul.f32 %v397_v30, %v298_v33  ;;  %vm301_vm6 = vcmp.lt.f32.partialorder %v300_v34, 0.0004427343  ;;  %s325_s11 = sshll.u32 %s453_s1, 4  ;;  %s326_s11 = int_to_ptr.vmem [resolvable:$true] %s325_s11 }
 0x2ba   :  { %v296_v36 = vmul.f32 0.6931472, %v399_v35  ;;  %s422_s12 = scalar_lea.vmem %s326_s11, 32  ;;  %p427_p9 = scmp.lt.s32.totalorder %s326_s11, %s326_s11 }
 0x2bb   :  { %p423_p8 = scmp.ne.s32.totalorder %s326_s11, %s422_s12  ;;  %p428_p10 = scmp.lt.s32.totalorder %s422_s12, %s422_s12 }
 0x2bc   :  { %v302_v39 = vsel %vm301_vm6, %v299_v37, %v296_v36 }
 0x2bd   :  { %v303_v40 = vadd.f32 %v302_v39, %v289_v38  ;;  %p429_p11 = por %p428_p10, %p427_p9 }
 0x2bf   :  { %305 = vrot.lane.b32.xlu0 %v303_v40, %s452_s10  ;;  %p430_p12 = pnand %p429_p11, %p423_p8 }
 0x331   :  { %v306_v41 = vpop.permute.xlu0 %305 }
 0x332   :  { %308 = vst.msk [vmem:[#allocation4] sm:$0x3] %vm287_vm5, %v306_v41 }
 0x333   :  { %433 = shalt.err (!%p430_p12)
}
 0x334   :  { %s434_s0 = scalar_lea.hbm %s566_s8, 32 }
 0x335   :  { %p435_p13 = scmp.ne.s32.totalorder %s566_s8, %s434_s0  ;;  %p438_p0 = scmp.lt.u32.totalorder %s434_s0, %s566_s8 }
 0x337   :  { %p440_p1 = pnand %p438_p0, %p435_p13 }
 0x339   :  { %443 = shalt.err (!%p440_p1)
}
 0x33a   :  { %328 = dma.vmem_to_hbm [thread:$0]  %s326_s11, 32, %s566_s8, [#allocation5]  }
 0x33b   :  { %444 = dma.done.wait [#allocation3], 32  }
 0x33c   :  { %445 = vsyncadd [#allocation3], 4294967264 }
 0x33d   :  { %446 = dma.done.wait [#allocation5], 32  }
 0x33e   :  { %447 = vsyncadd [#allocation5], 4294967264 }
 0x33f   :  { %335 = vsyncpa [#allocation3], 1 }
 0x340   :  { %336 = vsyncpa [#allocation5], 1 }

</bundles_post_ra>
